<compile_context>
chip_gen: v7x
topology: tpu7x:2x2x1
jax: 0.10.0
libtpu: 0.0.40
codegen_flags: <defaults>
</compile_context>

<pallas_src>
import functools

import jax
import jax.numpy as jnp
from jax.experimental import pallas as pl
from jax.experimental.pallas import tpu as pltpu


_LANE_CHUNK = 4096  # lane chunk for f32 GAP accumulation (bounds the f32 temp)


def _gap_partial_sum(x_ref, chunk, valid_len=None):
    """f32 sum over the lane (HW) dim of a (Bt, C, L) block, chunked so the f32
    upcast temporary never exceeds Bt*C*chunk elements.  If valid_len is given,
    lanes >= valid_len are excluded (tail tile of the HW-tiled fallback)."""
    Bt, C, L = x_ref.shape
    acc = jnp.zeros((Bt, C, 1), jnp.float32)
    for c0 in range(0, L, chunk):
        sz = min(chunk, L - c0)
        part = x_ref[:, :, c0:c0 + sz].astype(jnp.float32)
        if valid_len is not None:
            idx = jax.lax.broadcasted_iota(jnp.int32, (Bt, C, sz), 2) + c0
            part = jnp.where(idx < valid_len, part, 0.0)
        acc = acc + jnp.sum(part, axis=-1, keepdims=True)
    return acc                                             # (Bt, C, 1) f32


def _attention_from_gap(gap, w1_ref, b1_ref, w2_ref, b2_ref):
    """FC1 -> ReLU -> FC2 -> sigmoid in f32, column layout (Bt, C, 1).
    Keeping C on the sublane axis lets the result broadcast over the HW lanes
    of the x tile with no relayout."""
    Bt = gap.shape[0]
    w1 = jnp.broadcast_to(w1_ref[...], (Bt,) + w1_ref.shape)      # (Bt, Cr, C)
    h = jnp.einsum('brc,bci->bri', w1, gap,
                   preferred_element_type=jnp.float32) + b1_ref[...]
    h = jnp.maximum(h, 0.0)                                        # (Bt, Cr, 1)
    w2 = jnp.broadcast_to(w2_ref[...], (Bt,) + w2_ref.shape)      # (Bt, C, Cr)
    f = jnp.einsum('bcr,bri->bci', w2, h,
                   preferred_element_type=jnp.float32) + b2_ref[...]
    return jax.nn.sigmoid(f)                                       # (Bt, C, 1)


# ---------------- single-pass fused kernel (main path) ----------------------
def _ca_fused_kernel(x_ref, w1_ref, b1_ref, w2_ref, b2_ref, out_ref, *,
                     inv_hw, chunk):
    gap = _gap_partial_sum(x_ref, chunk) * inv_hw                  # (Bt, C, 1)
    att = _attention_from_gap(gap, w1_ref, b1_ref, w2_ref, b2_ref)
    # Rescale straight from the ref, in the I/O dtype (bf16 VALU on v6e/v7x).
    out_ref[...] = x_ref[...] * att.astype(out_ref.dtype)


# ---------------- HW-tiled fallback: pass 1 (attention) ---------------------
def _ca_att_kernel(x_ref, w1_ref, b1_ref, w2_ref, b2_ref, att_ref, *,
                   hw_total, hw_tile, chunk, inv_hw):
    j = pl.program_id(1)

    @pl.when(j == 0)
    def _init():
        att_ref[...] = jnp.zeros_like(att_ref)

    # Lanes of this HW tile that lie inside [0, HW); the last tile is partial.
    valid = hw_total - j * hw_tile
    att_ref[...] += _gap_partial_sum(x_ref, chunk, valid_len=valid)

    @pl.when(j == pl.num_programs(1) - 1)
    def _finalize():
        gap = att_ref[...] * inv_hw
        att_ref[...] = _attention_from_gap(gap, w1_ref, b1_ref, w2_ref, b2_ref)


# ---------------- HW-tiled fallback: pass 2 (rescale) -----------------------
def _ca_rescale_kernel(x_ref, att_ref, out_ref):
    out_ref[...] = x_ref[...] * att_ref[...].astype(out_ref.dtype)


def _vmem_capacity_bytes():
    try:
        return int(pltpu.get_tpu_info().vmem_capacity_bytes)
    except Exception:
        return 64 * 1024 * 1024          # conservative default (v7x per-core)


def channel_attention(x, w1, b1, w2, b2, *, donate_input=False,
                      buffer_budget_bytes=None):
    """ChannelAttention forward.  x: (B, C, H, W); w1: (Cr, C); b1: (Cr,);
    w2: (C, Cr); b2: (C,).  Returns x * sigmoid(FC2(relu(FC1(GAP(x)))))."""
    B, C, H, W = x.shape
    Cr = w1.shape[0]
    HW = H * W
    itemsize = jnp.dtype(x.dtype).itemsize

    vmem_cap = _vmem_capacity_bytes()
    # ~68% of physical VMEM for the double-buffered x blocks + kernel temps;
    # the rest is headroom for weights / compiler scratch.  Explicit limit so
    # the defaults (16/32 MiB scoped) never gate the pipeline.
    buffer_budget = buffer_budget_bytes or int(0.68 * vmem_cap)
    vmem_limit = int(0.92 * vmem_cap)

    x_flat = x.reshape(B, C, HW)                  # free reshape, no copy/pad
    w1c = w1.astype(jnp.float32)                  # (Cr, C)
    b1c = b1.reshape(Cr, 1).astype(jnp.float32)   # column biases
    w2c = w2.astype(jnp.float32)                  # (C, Cr)
    b2c = b2.reshape(C, 1).astype(jnp.float32)
    weight_args = (w1c, b1c, w2c, b2c)
    weight_specs = [
        pl.BlockSpec((Cr, C), lambda *_: (0, 0)),
        pl.BlockSpec((Cr, 1), lambda *_: (0, 0)),
        pl.BlockSpec((C, Cr), lambda *_: (0, 0)),
        pl.BlockSpec((C, 1), lambda *_: (0, 0)),
    ]
    inv_hw = 1.0 / float(HW)

    # ---- main path: whole (Bt, C, HW) batch tile resident in VMEM ----------
    chunk = min(HW, _LANE_CHUNK)
    col_pad = ((C + 7) // 8) * 8 * 128 * 4        # one lane-padded (C,1) f32 col
    per_b = (4 * C * HW * itemsize                # dbl-buffered in + out blocks
             + C * chunk * 4                      # f32 chunk-upcast temporary
             + 6 * col_pad)                       # gap/h/f/att column temps
    if per_b <= buffer_budget:
        bt_cap = max(1, buffer_budget // per_b)
        divs = [d for d in range(1, min(B, bt_cap) + 1) if B % d == 0]
        Bt = max(divs)
        n_steps = B // Bt
        # Prefer an even step count (v7x megacore shards the 'parallel' axis
        # across 2 TensorCores) only when per-step blocks stay >= 8 MiB, so the
        # extra ~0.35us/step is noise on single-TC v5e/v6e as well.
        if n_steps % 2 == 1 and B > 1:
            even = [d for d in divs
                    if (B // d) % 2 == 0 and d * C * HW * itemsize >= (8 << 20)]
            if even:
                Bt = max(even)
                n_steps = B // Bt

        cost = pl.CostEstimate(
            flops=int(3 * B * C * HW + 4 * B * C * Cr),
            transcendentals=int(B * C),
            bytes_accessed=int(2 * B * C * HW * itemsize))

        out_flat = pl.pallas_call(
            functools.partial(_ca_fused_kernel, inv_hw=inv_hw, chunk=chunk),
            out_shape=jax.ShapeDtypeStruct((B, C, HW), x.dtype),
            grid_spec=pltpu.PrefetchScalarGridSpec(
                num_scalar_prefetch=0,
                grid=(n_steps,),
                in_specs=[pl.BlockSpec((Bt, C, HW), lambda i: (i, 0, 0))]
                         + weight_specs,
                out_specs=pl.BlockSpec((Bt, C, HW), lambda i: (i, 0, 0)),
            ),
            compiler_params=pltpu.CompilerParams(
                dimension_semantics=("parallel",),
                vmem_limit_bytes=vmem_limit),
            cost_estimate=cost,
            input_output_aliases=({0: 0} if donate_input else {}),
        )(x_flat, *weight_args)
        return out_flat.reshape(B, C, H, W)

    # ---- HW-tiled fallback: a single batch element exceeds the budget ------
    # Pass 1 computes the (B, C, 1) attention (GAP accumulated across HW tiles
    # into the resident output block); pass 2 re-reads x and rescales.  Costs
    # one extra read of x (~1.5x traffic) but stays within VMEM for any C*H*W.
    hwt_raw = max(128, buffer_budget // (4 * C * itemsize))
    if hwt_raw >= HW:
        HWt = HW
    else:
        HWt = max(128, (hwt_raw // 128) * 128)
    n_hw = -(-HW // HWt)
    fchunk = min(HWt, _LANE_CHUNK)

    att = pl.pallas_call(
        functools.partial(_ca_att_kernel, hw_total=HW, hw_tile=HWt,
                          chunk=fchunk, inv_hw=inv_hw),
        out_shape=jax.ShapeDtypeStruct((B, C, 1), jnp.float32),
        grid_spec=pltpu.PrefetchScalarGridSpec(
            num_scalar_prefetch=0,
            grid=(B, n_hw),
            in_specs=[pl.BlockSpec((1, C, HWt), lambda b, j: (b, 0, j))]
                     + weight_specs,
            out_specs=pl.BlockSpec((1, C, 1), lambda b, j: (b, 0, 0)),
        ),
        compiler_params=pltpu.CompilerParams(
            dimension_semantics=("parallel", "arbitrary"),
            vmem_limit_bytes=vmem_limit),
    )(x_flat, *weight_args)

    out_flat = pl.pallas_call(
        _ca_rescale_kernel,
        out_shape=jax.ShapeDtypeStruct((B, C, HW), x.dtype),
        grid_spec=pltpu.PrefetchScalarGridSpec(
            num_scalar_prefetch=0,
            grid=(B, n_hw),
            in_specs=[pl.BlockSpec((1, C, HWt), lambda b, j: (b, 0, j)),
                      pl.BlockSpec((1, C, 1), lambda b, j: (b, 0, 0))],
            out_specs=pl.BlockSpec((1, C, HWt), lambda b, j: (b, 0, j)),
        ),
        compiler_params=pltpu.CompilerParams(
            dimension_semantics=("parallel", "parallel"),
            vmem_limit_bytes=vmem_limit),
    )(x_flat, att)
    return out_flat.reshape(B, C, H, W)


# --------------------------- reference & demo --------------------------------
def _reference(x, w1, b1, w2, b2):
    xf = x.astype(jnp.float32)
    gap = jnp.mean(xf, axis=(2, 3))                               # (B, C)
    h = jnp.maximum(gap @ w1.astype(jnp.float32).T
                    + b1.astype(jnp.float32), 0.0)                # (B, Cr)
    f = h @ w2.astype(jnp.float32).T + b2.astype(jnp.float32)     # (B, C)
    att = jax.nn.sigmoid(f)[:, :, None, None]
    return xf * att


if __name__ == "__main__":
    def run_case(B, C, H, W, reduction, key, dtype=jnp.float32, tol=2e-5,
                 buffer_budget_bytes=None):
        Cr = max(1, C // reduction)
        kx, k1, k2, k3, k4 = jax.random.split(key, 5)
        x = jax.random.normal(kx, (B, C, H, W), dtype=jnp.float32).astype(dtype)
        # nn.Linear layout: weight is (out_features, in_features)
        w1 = 0.1 * jax.random.normal(k1, (Cr, C), dtype=jnp.float32)
        b1 = 0.1 * jax.random.normal(k2, (Cr,), dtype=jnp.float32)
        w2 = 0.1 * jax.random.normal(k3, (C, Cr), dtype=jnp.float32)
        b2 = 0.1 * jax.random.normal(k4, (C,), dtype=jnp.float32)

        out = jax.block_until_ready(
            channel_attention(x, w1, b1, w2, b2,
                              buffer_budget_bytes=buffer_budget_bytes))
        ref = _reference(x, w1, b1, w2, b2)
        assert out.shape == (B, C, H, W)
        assert out.dtype == x.dtype
        assert jnp.allclose(out.astype(jnp.float32), ref, atol=tol, rtol=tol), (
            f"mismatch vs reference (B={B},C={C},H={H},W={W},dtype={dtype})")

    key = jax.random.PRNGKey(0)
    k1, k2, k3, k4 = jax.random.split(key, 4)
    # ChannelAttention(num_chans=32, reduction=16) -> hidden = 2
    run_case(B=2, C=32, H=16, W=16, reduction=16, key=k1)              # fused path
    run_case(B=5, C=32, H=10, W=10, reduction=16, key=k2)              # odd B / HW
    run_case(B=4, C=32, H=16, W=16, reduction=16, key=k3,
             dtype=jnp.bfloat16, tol=3e-2)                             # bf16 I/O
    # Force the HW-tiled two-pass fallback (tiny budget -> 128-lane HW tiles
    # with a masked tail) so that path is exercised and verified too.
    run_case(B=2, C=32, H=18, W=18, reduction=16, key=k4,
             buffer_budget_bytes=96 * 1024)
    print("KERNEL_OK")
</pallas_src>

<mosaic_0001>
module attributes {stable_mosaic.version = 11 : i64} {
  func.func @_ca_fused_kernel(%arg0: i32, %arg1: memref<2x32x256xf32, #tpu.memory_space<vmem>>, %arg2: memref<2x32xf32, #tpu.memory_space<vmem>>, %arg3: memref<2x1xf32, #tpu.memory_space<vmem>>, %arg4: memref<32x2xf32, #tpu.memory_space<vmem>>, %arg5: memref<32x1xf32, #tpu.memory_space<vmem>>, %arg6: memref<2x32x256xf32, #tpu.memory_space<vmem>>) attributes {dimension_semantics = [#tpu.dimension_semantics<parallel>], iteration_bounds = array<i64: 1>, scalar_prefetch = 0 : i64, scratch_operands = 0 : i64, tpu.core_type = #tpu.core_type<tc>, window_params = [{transform_indices = @transform_0, window_bounds = array<i64: 2, 32, 256>}, {pipeline_mode = #tpu.pipeline_mode<synchronous>, transform_indices = @transform_1, window_bounds = array<i64: 2, 32>}, {pipeline_mode = #tpu.pipeline_mode<synchronous>, transform_indices = @transform_2, window_bounds = array<i64: 2, 1>}, {pipeline_mode = #tpu.pipeline_mode<synchronous>, transform_indices = @transform_3, window_bounds = array<i64: 32, 2>}, {pipeline_mode = #tpu.pipeline_mode<synchronous>, transform_indices = @transform_4, window_bounds = array<i64: 32, 1>}, {transform_indices = @transform_5, window_bounds = array<i64: 2, 32, 256>}]} {
    %cst = arith.constant 0.000000e+00 : f32
    %0 = vector.broadcast %cst : f32 to vector<2x32x1xf32>
    %c0 = arith.constant 0 : index
    %c0_0 = arith.constant 0 : index
    %c0_1 = arith.constant 0 : index
    %1 = vector.load %arg1[%c0, %c0_0, %c0_1] : memref<2x32x256xf32, #tpu.memory_space<vmem>>, vector<2x32x256xf32>
    %cst_2 = arith.constant dense<0.000000e+00> : vector<2x32xf32>
    %2 = vector.multi_reduction <add>, %1, %cst_2 [2] : vector<2x32x256xf32> to vector<2x32xf32>
    %3 = vector.shape_cast %2 : vector<2x32xf32> to vector<2x32x1xf32>
    %4 = arith.addf %0, %3 : vector<2x32x1xf32>
    %cst_3 = arith.constant 3.906250e-03 : f32
    %5 = vector.broadcast %cst_3 : f32 to vector<2x32x1xf32>
    %6 = arith.mulf %4, %5 : vector<2x32x1xf32>
    %c0_4 = arith.constant 0 : index
    %c0_5 = arith.constant 0 : index
    %7 = vector.load %arg2[%c0_4, %c0_5] : memref<2x32xf32, #tpu.memory_space<vmem>>, vector<2x32xf32>
    %8 = vector.shape_cast %7 : vector<2x32xf32> to vector<1x2x32xf32>
    %9 = vector.broadcast %8 : vector<1x2x32xf32> to vector<2x2x32xf32>
    "tpu.trace_start"() <{level = 10 : i32, message = "brc,bci->bri"}> : () -> ()
    %cst_6 = arith.constant dense<0.000000e+00> : vector<2x2x1xf32>
    %10 = tpu.matmul %9, %6, %cst_6 {dimension_numbers = #tpu.dot_dimension_numbers<[2], [1], [1], [2], [0, 0, 0, 1, 1, 2], [0], [0]>} : vector<2x2x32xf32>, vector<2x32x1xf32>, vector<2x2x1xf32> -> vector<2x2x1xf32>
    "tpu.trace_stop"() : () -> ()
    %c0_7 = arith.constant 0 : index
    %c0_8 = arith.constant 0 : index
    %11 = vector.load %arg3[%c0_7, %c0_8] : memref<2x1xf32, #tpu.memory_space<vmem>>, vector<2x1xf32>
    %12 = vector.shape_cast %11 : vector<2x1xf32> to vector<1x2x1xf32>
    %13 = vector.broadcast %12 : vector<1x2x1xf32> to vector<2x2x1xf32>
    %14 = arith.addf %10, %13 : vector<2x2x1xf32>
    %cst_9 = arith.constant 0.000000e+00 : f32
    %15 = vector.broadcast %cst_9 : f32 to vector<2x2x1xf32>
    %16 = arith.maximumf %14, %15 : vector<2x2x1xf32>
    %c0_10 = arith.constant 0 : index
    %c0_11 = arith.constant 0 : index
    %17 = vector.load %arg4[%c0_10, %c0_11] : memref<32x2xf32, #tpu.memory_space<vmem>>, vector<32x2xf32>
    %18 = vector.shape_cast %17 : vector<32x2xf32> to vector<1x32x2xf32>
    %19 = vector.broadcast %18 : vector<1x32x2xf32> to vector<2x32x2xf32>
    "tpu.trace_start"() <{level = 10 : i32, message = "bcr,bri->bci"}> : () -> ()
    %cst_12 = arith.constant dense<0.000000e+00> : vector<2x32x1xf32>
    %20 = tpu.matmul %19, %16, %cst_12 {dimension_numbers = #tpu.dot_dimension_numbers<[2], [1], [1], [2], [0, 0, 0, 1, 1, 2], [0], [0]>} : vector<2x32x2xf32>, vector<2x2x1xf32>, vector<2x32x1xf32> -> vector<2x32x1xf32>
    "tpu.trace_stop"() : () -> ()
    %c0_13 = arith.constant 0 : index
    %c0_14 = arith.constant 0 : index
    %21 = vector.load %arg5[%c0_13, %c0_14] : memref<32x1xf32, #tpu.memory_space<vmem>>, vector<32x1xf32>
    %22 = vector.shape_cast %21 : vector<32x1xf32> to vector<1x32x1xf32>
    %23 = vector.broadcast %22 : vector<1x32x1xf32> to vector<2x32x1xf32>
    %24 = arith.addf %20, %23 : vector<2x32x1xf32>
    %25 = arith.negf %24 : vector<2x32x1xf32>
    %26 = math.exp %25 : vector<2x32x1xf32>
    %cst_15 = arith.constant 1.000000e+00 : f32
    %27 = vector.broadcast %cst_15 : f32 to vector<2x32x1xf32>
    %28 = arith.addf %27, %26 : vector<2x32x1xf32>
    %29 = arith.divf %27, %28 : vector<2x32x1xf32>
    %c0_16 = arith.constant 0 : index
    %c0_17 = arith.constant 0 : index
    %c0_18 = arith.constant 0 : index
    %30 = vector.load %arg1[%c0_16, %c0_17, %c0_18] : memref<2x32x256xf32, #tpu.memory_space<vmem>>, vector<2x32x256xf32>
    %31 = vector.broadcast %29 : vector<2x32x1xf32> to vector<2x32x256xf32>
    %32 = arith.mulf %30, %31 : vector<2x32x256xf32>
    %c0_19 = arith.constant 0 : index
    %c0_20 = arith.constant 0 : index
    %c0_21 = arith.constant 0 : index
    %33 = vector.load %arg6[%c0_19, %c0_20, %c0_21] : memref<2x32x256xf32, #tpu.memory_space<vmem>>, vector<2x32x256xf32>
    tpu.vector_store %arg6[%c0_19, %c0_20, %c0_21], %32 {strides = array<i32>} : memref<2x32x256xf32, #tpu.memory_space<vmem>>, vector<2x32x256xf32>,
    return
  }
  func.func @transform_0(%arg0: i32) -> (i32, i32, i32) {
    %c0_i32 = arith.constant 0 : i32
    %c0_i32_0 = arith.constant 0 : i32
    %c0_i32_1 = arith.constant 0 : i32
    return %arg0, %c0_i32, %c0_i32_0 : i32, i32, i32
  }
  func.func @transform_1(%arg0: i32) -> (i32, i32) {
    %c0_i32 = arith.constant 0 : i32
    %c0_i32_0 = arith.constant 0 : i32
    %c0_i32_1 = arith.constant 0 : i32
    return %c0_i32, %c0_i32_0 : i32, i32
  }
  func.func @transform_2(%arg0: i32) -> (i32, i32) {
    %c0_i32 = arith.constant 0 : i32
    %c0_i32_0 = arith.constant 0 : i32
    %c0_i32_1 = arith.constant 0 : i32
    return %c0_i32, %c0_i32_0 : i32, i32
  }
  func.func @transform_3(%arg0: i32) -> (i32, i32) {
    %c0_i32 = arith.constant 0 : i32
    %c0_i32_0 = arith.constant 0 : i32
    %c0_i32_1 = arith.constant 0 : i32
    return %c0_i32, %c0_i32_0 : i32, i32
  }
  func.func @transform_4(%arg0: i32) -> (i32, i32) {
    %c0_i32 = arith.constant 0 : i32
    %c0_i32_0 = arith.constant 0 : i32
    %c0_i32_1 = arith.constant 0 : i32
    return %c0_i32, %c0_i32_0 : i32, i32
  }
  func.func @transform_5(%arg0: i32) -> (i32, i32, i32) {
    %c0_i32 = arith.constant 0 : i32
    %c0_i32_0 = arith.constant 0 : i32
    %c0_i32_1 = arith.constant 0 : i32
    return %arg0, %c0_i32, %c0_i32_0 : i32, i32, i32
  }
}

</mosaic_0001>

<bundles_post_ra>
// kernel: tpu_custom_call.1
= control target key start
LH: loop header
LB: loop body
LE: loop exit
PB: predicated region body
PF: predicated region fallthrough
CT: control target
= control target key end

     0   :  { %10 = vsyncpa [#allocation3], 0  ;;  %s940_s0 = inlined_call_operand.hbm [shape: f32[2,32,256], index: 0, kind: input, shape index: {}]   ;;  %s941_s1 = inlined_call_operand.vmem [shape: f32[2,32], index: 1, kind: input, shape index: {}]   ;;  %s942_s2 = inlined_call_operand.vmem [shape: f32[2,1], index: 2, kind: input, shape index: {}]   ;;  %s943_s3 = inlined_call_operand.vmem [shape: f32[32,2], index: 3, kind: input, shape index: {}]   ;;  %s944_s4 = inlined_call_operand.vmem [shape: f32[32,1], index: 4, kind: input, shape index: {}]   ;;  %s945_s5 = inlined_call_operand.hbm [shape: f32[2,32,256], index: 5, kind: output, shape index: {}]  }
   0x1   :  { %11 = vsyncpa [#allocation4], 0  ;;  %s770_s18 = smov [#allocation2]   ;;  %s722_s22 = scalar_lea.hbm %s940_s0, 2048 }
   0x2   :  { %s17_s19 = sshll.u32 %s770_s18, 4  ;;  %p723_p0 = scmp.ne.s32.totalorder %s940_s0, %s722_s22  ;;  %s18_s19 = int_to_ptr.vmem [resolvable:$true] %s17_s19 }
   0x3   :  { %p726_p1 = scmp.lt.u32.totalorder %s722_s22, %s940_s0 }
   0x5   :  { %p728_p2 = pnand %p726_p1, %p723_p0 }
   0x7   :  { %731 = shalt.err (!%p728_p2)
}
   0x8   :  { %s732_s27 = scalar_lea.vmem %s18_s19, 2048  ;;  %p737_p4 = scmp.lt.s32.totalorder %s18_s19, %s18_s19 }
   0x9   :  { %p733_p3 = scmp.ne.s32.totalorder %s18_s19, %s732_s27  ;;  %p738_p5 = scmp.lt.s32.totalorder %s732_s27, %s732_s27 }
   0xb   :  { %p739_p6 = por %p738_p5, %p737_p4 }
   0xd   :  { %p740_p7 = pnand %p739_p6, %p733_p3 }
   0xf   :  { %743 = shalt.err (!%p740_p7)
}
  0x10   :  { %s771_s28 = smov 256   ;;  %s772_s29 = smov 16  }
  0x11   :  { %23 = dma.hbm_to_vmem [thread:$0]  %s940_s0, 2048, %s18_s19, [#allocation3], %s771_s28, %s771_s28, %s772_s29  }
  0x12   :  { %766 = dma.done.wait [#allocation3], 2048  }
  0x13   :  { %767 = vsyncadd [#allocation3], 4294965248  ;;  %v823_v0 = vld [vmem:[#allocation2 + $0x40] sm:$0xff]  ;;  %v825_v1 = vld [vmem:[#allocation2 + $0x48] sm:$0xff]  ;;  %v773_v24 = vmov 0.0|0.0   ;;  %vm774_vm0 = vmmov 0  }
  0x14   :  { %v827_v2 = vld [vmem:[#allocation2] sm:$0xff]  ;;  %v63_v3 = vadd.f32 %v825_v1, %v823_v0  ;;  %v831_v4 = vld [vmem:[#allocation2 + $0x8] sm:$0xff]  ;;  %v833_v5 = vld [vmem:[#allocation2 + $0x50] sm:$0xff]  ;;  %668 = vmatprep.subr.bf16.mxu0 %v773_v24  ;;  %674 = vmatprep.subr.bf16.mxu1 %v773_v24  ;;  %v775_v25 = vmov 0.0   ;;  %vm93_vm1 = vcmask 261120   ;;  %vm247_vm2 = vcmask 15360  }
  0x15   :  { %v835_v6 = vld [vmem:[#allocation2 + $0x58] sm:$0xff]  ;;  %v51_v7 = vadd.f32 %v831_v4, %v827_v2  ;;  %v839_v8 = vld [vmem:[#allocation2 + $0x10] sm:$0xff]  ;;  %v851_v14 = vld [vmem:[#allocation2 + $0x20] sm:$0xff]  ;;  %638 = vmatprep.mubr.msk.f32.mxu0 %vm774_vm0, %v775_v25  ;;  %649 = vmatprep.mubr.msk.f32.mxu1 %vm774_vm0, %v775_v25  ;;  %vm260_vm3 = vcmask 1041408   ;;  %v776_v60 = vmov 0  }
  0x16   :  { %v841_v9 = vld [vmem:[#allocation2 + $0x18] sm:$0xff]  ;;  %64 = vadd.xlane.f32.xlu1 %v63_v3  ;;  %v66_v10 = vadd.f32 %v835_v6, %v833_v5  ;;  %v847_v12 = vld [vmem:[#allocation2 + $0x30] sm:$0xff]  ;;  %v853_v15 = vld [vmem:[#allocation2 + $0x28] sm:$0xff]  ;;  %688 = vset.pattern.permute.xlu0 %v776_v60 }
  0x17   :  { %52 = vadd.xlane.f32.xlu0 %v51_v7  ;;  %v54_v11 = vadd.f32 %v841_v9, %v839_v8  ;;  %v849_v13 = vld [vmem:[#allocation2 + $0x38] sm:$0xff]  ;;  %v57_v17 = vadd.f32 %v853_v15, %v851_v14  ;;  %v859_v18 = vld [vmem:[#allocation2 + $0x70] sm:$0xff]  ;;  %v863_v20 = vld [vmem:[#allocation2 + $0x60] sm:$0xff]  ;;  %689 = vset.pattern.permute.xlu1 %v776_v60 }
  0x18   :  { %v60_v16 = vadd.f32 %v849_v13, %v847_v12  ;;  %v861_v19 = vld [vmem:[#allocation2 + $0x78] sm:$0xff]  ;;  %v865_v21 = vld [vmem:[#allocation2 + $0x68] sm:$0xff]  ;;  %v91_v45 = vld [vmem:[%s941_s1] sm:$0x3] }
  0x19   :  { %v72_v22 = vadd.f32 %v861_v19, %v859_v18  ;;  %v69_v23 = vadd.f32 %v865_v21, %v863_v20  ;;  %v239_v47 = vld [vmem:[%s943_s3] sm:$0xff]  ;;  %v240_v54 = vld [vmem:[%s943_s3 + $0x8] sm:$0xff]  ;;  %v241_v57 = vld [vmem:[%s943_s3 + $0x10] sm:$0xff] }
  0x1a   :  { %67 = vadd.xlane.f32.xlu1 %v66_v10  ;;  %v92_v48 = vld [vmem:[%s942_s2] sm:$0x3]  ;;  %v242_v59 = vld [vmem:[%s943_s3 + $0x18] sm:$0xff]  ;;  %v244_v61 = vld [vmem:[%s944_s4 + $0x8] sm:$0xff] }
  0x1b   :  { %55 = vadd.xlane.f32.xlu0 %v54_v11  ;;  %v243_v62 = vld [vmem:[%s944_s4] sm:$0xff]  ;;  %v246_v11 = vld [vmem:[%s944_s4 + $0x18] sm:$0xff] }
  0x1e   :  { %61 = vadd.xlane.f32.xlu1 %v60_v16 }
  0x1f   :  { %58 = vadd.xlane.f32.xlu0 %v57_v17 }
  0x22   :  { %73 = vadd.xlane.f32.xlu1 %v72_v22 }
  0x23   :  { %70 = vadd.xlane.f32.xlu0 %v69_v23 }
  0xa3   :  { %v65_v26 = vpop.xlane.xlu1 %64 }
  0xa4   :  { %v53_v27 = vpop.xlane.xlu0 %52  ;;  %v87_v29 = vmul.f32 0.00390625, %v65_v26 }
  0xa5   :  { %v83_v32 = vmul.f32 0.00390625, %v53_v27 }
  0xa7   :  { %v68_v28 = vpop.xlane.xlu1 %67 }
  0xa8   :  { %v88_v30 = vmul.f32 0.00390625, %v68_v28  ;;  %v56_v31 = vpop.xlane.xlu0 %55  ;;  %v245_v28 = vld [vmem:[%s944_s4 + $0x10] sm:$0xff]  ;;  %s777_s4 = smov [#allocation5]  }
  0xa9   :  { %v84_v33 = vmul.f32 0.00390625, %v56_v31  ;;  %s578_s23 = sshll.u32 %s777_s4, 4  ;;  %s579_s23 = int_to_ptr.vmem [resolvable:$true] %s578_s23 }
  0xaa   :  { %v675_v34 = vpack.c.bf16 %v88_v30, %v87_v29  ;;  %s744_s24 = scalar_lea.vmem %s579_s23, 2048  ;;  %p749_p9 = scmp.lt.s32.totalorder %s579_s23, %s579_s23 }
  0xab   :  { %v62_v35 = vpop.xlane.xlu1 %61  ;;  %v669_v36 = vpack.c.bf16 %v84_v33, %v83_v32  ;;  %p745_p8 = scmp.ne.s32.totalorder %s579_s23, %s744_s24  ;;  %p750_p10 = scmp.lt.s32.totalorder %s744_s24, %s744_s24 }
  0xac   :  { %v86_v37 = vmul.f32 0.00390625, %v62_v35  ;;  %v59_v38 = vpop.xlane.xlu0 %58  ;;  %676 = vmatpush3.bf16.msra.mxu1 %v675_v34 }
  0xad   :  { %v85_v39 = vmul.f32 0.00390625, %v59_v38  ;;  %670 = vmatpush3.bf16.msra.mxu0 %v669_v36  ;;  %677 = vmatprep.subr.bf16.mxu1 %v773_v24  ;;  %p751_p11 = por %p750_p10, %p749_p9 }
  0xae   :  { %671 = vmatprep.subr.bf16.mxu0 %v773_v24 }
  0xaf   :  { %v672_v40 = vpack.c.bf16 %v86_v37, %v85_v39  ;;  %v74_v41 = vpop.xlane.xlu1 %73  ;;  %p752_p12 = pnand %p751_p11, %p745_p8 }
  0xb0   :  { %v90_v42 = vmul.f32 0.00390625, %v74_v41  ;;  %v71_v43 = vpop.xlane.xlu0 %70 }
  0xb1   :  { %v89_v44 = vmul.f32 0.00390625, %v71_v43  ;;  %673 = vmatpush3.bf16.msra.mxu0 %v672_v40 }
  0xb3   :  { %v678_v46 = vpack.c.bf16 %v90_v42, %v89_v44 }
  0xb4   :  { %639 = vmatmul.mubr.msk.f32.vlgmr.msra.gmra.mrb[0].mxu0 %vm93_vm1, %v91_v45 }
  0xb5   :  { %679 = vmatpush3.bf16.msra.mxu1 %v678_v46  ;;  %654 = vmatprep.mubr.msk.f32.mxu0 %vm247_vm2, %v239_v47 }
  0xb8   :  { %650 = vmatmul.mubr.msk.f32.vlgmr.msra.gmra.mrb[0].mxu1 %vm93_vm1, %v91_v45 }
  0xb9   :  { %662 = vmatprep.mubr.msk.f32.mxu1 %vm247_vm2, %v239_v47 }
 0x187   :  { %v163_v49 = vpop.f32.mrb[0].mxu0 }
 0x188   :  { %v164_v50 = vadd.f32 %v163_v49, %v92_v48  ;;  %v640_v51 = vpop.f32.mrb[1].mxu0 }
 0x18a   :  { %v237_v52 = vmax.f32 %v164_v50, 0.0 }
 0x18b   :  { %v233_v53 = vpop.f32.mrb[0].mxu1 }
 0x18c   :  { %v234_v55 = vadd.f32 %v233_v53, %v92_v48  ;;  %v651_v56 = vpop.f32.mrb[1].mxu1  ;;  %652 = vmatprep.subr.msk.mxu0 %vm260_vm3, %v237_v52 }
 0x18d   :  { %653 = vmatpush3.msk.msra.mxu0 %vm260_vm3, %v237_v52 }
 0x18e   :  { %v238_v58 = vmax.f32 %v234_v55, 0.0  ;;  %655 = vmatmul.mubr.msk.f32.vlgmr.msra.gmra.mrb[2].mxu0 %vm247_vm2, %v240_v54 }
 0x18f   :  { %657 = vmatprep.mubr.msk.f32.mxu0 %vm247_vm2, %v241_v57 }
 0x190   :  { %660 = vmatprep.subr.msk.mxu1 %vm260_vm3, %v238_v58 }
 0x191   :  { %661 = vmatpush3.msk.msra.mxu1 %vm260_vm3, %v238_v58 }
 0x192   :  { %663 = vmatmul.mubr.msk.f32.vlgmr.msra.gmra.mrb[2].mxu1 %vm247_vm2, %v240_v54  ;;  %658 = vmatmul.mubr.msk.f32.gmra.mrb[4].mxu0 %vm247_vm2, %v242_v59 }
 0x193   :  { %665 = vmatprep.mubr.msk.f32.mxu1 %vm247_vm2, %v241_v57 }
 0x196   :  { %666 = vmatmul.mubr.msk.f32.gmra.mrb[4].mxu1 %vm247_vm2, %v242_v59 }
 0x261   :  { %v656_v63 = vpop.f32.mrb[2].mxu0 }
 0x262   :  { %v336_v3 = vadd.f32 %v656_v63, %v244_v61  ;;  %v330_v7 = vpop.f32.mrb[3].mxu0 }
 0x263   :  { %v331_v10 = vadd.f32 %v330_v7, %v243_v62 }
 0x264   :  { %v603_v16 = vmul.f32 -1.442695, %v336_v3 }
 0x265   :  { %v602_v17 = vmul.f32 -1.442695, %v331_v10  ;;  %v664_v22 = vpop.f32.mrb[2].mxu1  ;;  %v659_v23 = vpop.f32.mrb[4].mxu0 }
 0x266   :  { %690 = vpow2.f32 %v603_v16  ;;  %v424_v24 = vadd.f32 %v664_v22, %v244_v61  ;;  %v418_v25 = vpop.f32.mrb[3].mxu1  ;;  %v346_v26 = vadd.f32 %v659_v23, %v246_v11  ;;  %v340_v27 = vpop.f32.mrb[5].mxu0 }
 0x267   :  { %692 = vpow2.f32 %v602_v17  ;;  %v419_v29 = vadd.f32 %v418_v25, %v243_v62  ;;  %v341_v33 = vadd.f32 %v340_v27, %v245_v28 }
 0x268   :  { %v607_v30 = vmul.f32 -1.442695, %v424_v24  ;;  %v605_v31 = vmul.f32 -1.442695, %v346_v26 }
 0x269   :  { %v606_v32 = vmul.f32 -1.442695, %v419_v29  ;;  %v667_v34 = vpop.f32.mrb[4].mxu1  ;;  %v604_v37 = vmul.f32 -1.442695, %v341_v33 }
 0x26a   :  { %694 = vpow2.f32 %v607_v30  ;;  %v428_v35 = vpop.f32.mrb[5].mxu1  ;;  %v434_v43 = vadd.f32 %v667_v34, %v246_v11 }
 0x26b   :  { %696 = vpow2.f32 %v606_v32  ;;  %v429_v36 = vadd.f32 %v428_v35, %v245_v28 }
 0x26c   :  { %698 = vpow2.f32 %v605_v31  ;;  %v609_v48 = vmul.f32 -1.442695, %v434_v43 }
 0x26d   :  { %v608_v38 = vmul.f32 -1.442695, %v429_v36  ;;  %700 = vpow2.f32 %v604_v37 }
 0x26f   :  { %702 = vpow2.f32 %v608_v38 }
 0x270   :  { %v691_v39 = vpop.eup %690 }
 0x271   :  { %v693_v40 = vpop.eup %692  ;;  %v462_v41 = vadd.f32 1.0, %v691_v39 }
 0x272   :  { %v461_v42 = vadd.f32 1.0, %v693_v40 }
 0x273   :  { %704 = vrcp.f32 %v462_v41 }
 0x274   :  { %v695_v44 = vpop.eup %694  ;;  %706 = vrcp.f32 %v461_v42 }
 0x275   :  { %v697_v45 = vpop.eup %696  ;;  %v466_v46 = vadd.f32 1.0, %v695_v44 }
 0x276   :  { %v699_v47 = vpop.eup %698  ;;  %v465_v49 = vadd.f32 1.0, %v697_v45 }
 0x277   :  { %708 = vrcp.f32 %v466_v46  ;;  %v464_v50 = vadd.f32 1.0, %v699_v47  ;;  %v701_v51 = vpop.eup %700 }
 0x278   :  { %710 = vpow2.f32 %v609_v48  ;;  %v463_v55 = vadd.f32 1.0, %v701_v51 }
 0x279   :  { %712 = vrcp.f32 %v465_v49  ;;  %v703_v52 = vpop.eup %702 }
 0x27a   :  { %714 = vrcp.f32 %v464_v50  ;;  %v467_v57 = vadd.f32 1.0, %v703_v52 }
 0x27b   :  { %716 = vrcp.f32 %v463_v55 }
 0x27c   :  { %718 = vrcp.f32 %v467_v57 }
 0x27d   :  { %v705_v53 = vpop.eup %704 }
 0x27e   :  { %v707_v54 = vpop.eup %706  ;;  %508 = vperm.xlu1 %689, %v705_v53  }
 0x27f   :  { %503 = vperm.xlu0 %688, %v707_v54  }
 0x281   :  { %v709_v56 = vpop.eup %708 }
 0x282   :  { %528 = vperm.xlu1 %689, %v709_v56   ;;  %v711_v58 = vpop.eup %710 }
 0x283   :  { %v713_v59 = vpop.eup %712  ;;  %v468_v61 = vadd.f32 1.0, %v711_v58 }
 0x284   :  { %v715_v60 = vpop.eup %714 }
 0x285   :  { %720 = vrcp.f32 %v468_v61  ;;  %v717_v62 = vpop.eup %716 }
 0x286   :  { %523 = vperm.xlu1 %689, %v713_v59   ;;  %v719_v63 = vpop.eup %718 }
 0x28a   :  { %518 = vperm.xlu1 %689, %v715_v60  }
 0x28e   :  { %513 = vperm.xlu1 %689, %v717_v62  }
 0x28f   :  { %v721_v3 = vpop.eup %720 }
 0x292   :  { %533 = vperm.xlu1 %689, %v719_v63  }
 0x296   :  { %538 = vperm.xlu1 %689, %v721_v3  }
 0x2fd   :  { %v509_v7 = vpop.permute.xlu1 %508 }
 0x2fe   :  { %v543_v10 = vmul.f32 %v509_v7, %v839_v8  ;;  %v544_v11 = vmul.f32 %v509_v7, %v841_v9  ;;  %v504_v16 = vpop.permute.xlu0 %503 }
 0x2ff   :  { %v541_v17 = vmul.f32 %v504_v16, %v827_v2  ;;  %v542_v22 = vmul.f32 %v504_v16, %v831_v4 }
 0x300   :  { %559 = vst [vmem:[#allocation5 + $0x10] sm:$0xff] %v543_v10  ;;  %560 = vst [vmem:[#allocation5 + $0x18] sm:$0xff] %v544_v11 }
 0x301   :  { %557 = vst [vmem:[#allocation5] sm:$0xff] %v541_v17  ;;  %558 = vst [vmem:[#allocation5 + $0x8] sm:$0xff] %v542_v22  ;;  %v529_v23 = vpop.permute.xlu1 %528 }
 0x302   :  { %v551_v24 = vmul.f32 %v529_v23, %v833_v5  ;;  %v552_v25 = vmul.f32 %v529_v23, %v835_v6 }
 0x304   :  { %567 = vst [vmem:[#allocation5 + $0x50] sm:$0xff] %v551_v24  ;;  %568 = vst [vmem:[#allocation5 + $0x58] sm:$0xff] %v552_v25 }
 0x305   :  { %v524_v26 = vpop.permute.xlu1 %523 }
 0x306   :  { %v549_v8 = vmul.f32 %v524_v26, %v823_v0  ;;  %v550_v9 = vmul.f32 %v524_v26, %v825_v1 }
 0x308   :  { %565 = vst [vmem:[#allocation5 + $0x40] sm:$0xff] %v549_v8  ;;  %566 = vst [vmem:[#allocation5 + $0x48] sm:$0xff] %v550_v9 }
 0x309   :  { %v519_v2 = vpop.permute.xlu1 %518 }
 0x30a   :  { %v547_v4 = vmul.f32 %v519_v2, %v847_v12  ;;  %v548_v27 = vmul.f32 %v519_v2, %v849_v13 }
 0x30c   :  { %563 = vst [vmem:[#allocation5 + $0x30] sm:$0xff] %v547_v4  ;;  %564 = vst [vmem:[#allocation5 + $0x38] sm:$0xff] %v548_v27 }
 0x30d   :  { %v514_v28 = vpop.permute.xlu1 %513 }
 0x30e   :  { %v545_v5 = vmul.f32 %v514_v28, %v851_v14  ;;  %v546_v6 = vmul.f32 %v514_v28, %v853_v15 }
 0x310   :  { %561 = vst [vmem:[#allocation5 + $0x20] sm:$0xff] %v545_v5  ;;  %562 = vst [vmem:[#allocation5 + $0x28] sm:$0xff] %v546_v6 }
 0x311   :  { %v534_v29 = vpop.permute.xlu1 %533 }
 0x312   :  { %v553_v0 = vmul.f32 %v534_v29, %v863_v20  ;;  %v554_v1 = vmul.f32 %v534_v29, %v865_v21 }
 0x314   :  { %569 = vst [vmem:[#allocation5 + $0x60] sm:$0xff] %v553_v0  ;;  %570 = vst [vmem:[#allocation5 + $0x68] sm:$0xff] %v554_v1 }
 0x315   :  { %v539_v12 = vpop.permute.xlu1 %538 }
 0x316   :  { %v555_v13 = vmul.f32 %v539_v12, %v859_v18  ;;  %v556_v30 = vmul.f32 %v539_v12, %v861_v19 }
 0x318   :  { %571 = vst [vmem:[#allocation5 + $0x70] sm:$0xff] %v555_v13  ;;  %572 = vst [vmem:[#allocation5 + $0x78] sm:$0xff] %v556_v30 }
 0x319   :  { %755 = shalt.err (!%p752_p12)
}
 0x31a   :  { %s756_s27 = scalar_lea.hbm %s945_s5, 2048 }
 0x31b   :  { %p757_p13 = scmp.ne.s32.totalorder %s945_s5, %s756_s27  ;;  %p760_p0 = scmp.lt.u32.totalorder %s756_s27, %s945_s5 }
 0x31d   :  { %p762_p1 = pnand %p760_p0, %p757_p13 }
 0x31f   :  { %765 = shalt.err (!%p762_p1)
}
 0x320   :  { %584 = dma.vmem_to_hbm [thread:$0]  %s579_s23, 2048, %s945_s5, [#allocation4], %s771_s28, %s771_s28, %s772_s29  }
 0x321   :  { %768 = dma.done.wait [#allocation4], 2048  }
 0x322   :  { %769 = vsyncadd [#allocation4], 4294965248 }
 0x323   :  { %588 = vsyncpa [#allocation3], 1 }
 0x324   :  { %589 = vsyncpa [#allocation4], 1 }

</bundles_post_ra>
